<compile_context>
chip_gen: v7x
topology: tpu7x:2x2x1
jax: 0.10.0
libtpu: 0.0.40
codegen_flags: <defaults>
</compile_context>

<pallas_src>
import jax
import jax.numpy as jnp
from jax.experimental import pallas as pl
from jax.experimental.pallas import tpu as pltpu


_LANE_CANDIDATES = (4096, 2048, 1024, 512, 256, 128)
_FALLBACK_LANE = 512                 # used only when numel isn't a multiple of 128
_TARGET_OUT_BLOCK_BYTES = 8 << 20    # ~8 MiB of f32 output per grid step
_MIN_GRID_STEPS = 4                  # keep both v7x TensorCores fed on mid-size clips


def _round_up(x: int, m: int) -> int:
    return ((x + m - 1) // m) * m


def _normalize_kernel(x_ref, o_ref):
    # Fused cast + pointwise normalize: out = f32(x) / 255
    # (uint8 -> int32 -> f32 keeps the conversion on the best-supported path.)
    o_ref[...] = x_ref[...].astype(jnp.int32).astype(jnp.float32) / 255.0


def _apply_functional_pallas(video: jax.Array, *, min_pallas_bytes: int = 1 << 20) -> jax.Array:
    """Pallas implementation of the wrapped functional (x -> x / 255, f32 out)."""
    orig_shape = video.shape
    total = 1
    for d in orig_shape:
        total *= d

    # Tiny clips: kernel-launch + per-step grid overhead dominates; plain XLA wins.
    if total * jnp.dtype(video.dtype).itemsize < min_pallas_bytes:
        return video.astype(jnp.float32) / 255.0

    # Lane-dense slab geometry.  Prefer an exact factorization (typical video
    # numel = T*C*H*W is a multiple of 128) so there is NO pad and NO slice,
    # i.e. no extra HBM passes outside the kernel.
    k = None
    for cand in _LANE_CANDIDATES:
        if total % cand == 0:
            k = cand
            break
    if k is None:
        k = _FALLBACK_LANE
    pad = (-total) % k
    rows = (total + pad) // k

    # Block rows: ~8 MiB of f32 output per step, multiple of 32 (uint8 packing),
    # clamped so the parallel grid keeps >= _MIN_GRID_STEPS steps for megacore.
    tr = max(32, (_TARGET_OUT_BLOCK_BYTES // (4 * k)) // 32 * 32)
    tr = min(tr, max(32, _round_up(-(-rows // _MIN_GRID_STEPS), 32)))
    if tr >= rows:
        tr = rows                    # single full-extent block (always legal)
    grid = pl.cdiv(rows, tr)         # ragged last block handled by Pallas masking

    flat = video.reshape(-1)
    if pad:
        flat = jnp.pad(flat, (0, pad))   # rare fallback; pads <= k-1 elements
    x2d = flat.reshape(rows, k)

    out2d = pl.pallas_call(
        _normalize_kernel,
        out_shape=jax.ShapeDtypeStruct((rows, k), jnp.float32),
        grid_spec=pl.GridSpec(
            grid=(grid,),
            in_specs=[pl.BlockSpec((tr, k), lambda i: (i, 0))],
            out_specs=pl.BlockSpec((tr, k), lambda i: (i, 0)),
        ),
        compiler_params=pltpu.CompilerParams(
            dimension_semantics=("parallel",),
            vmem_limit_bytes=32 * 1024 * 1024,
        ),
        cost_estimate=pl.CostEstimate(
            flops=total, transcendentals=0, bytes_accessed=5 * total),
    )(x2d)

    out_flat = out2d.reshape(-1)
    if pad:
        out_flat = out_flat[:total]      # rare fallback only
    return out_flat.reshape(orig_shape)


class FunctionalModule:
    """JAX/Pallas port of data_module.transforms.FunctionalModule."""

    # TODO(synk): only the representative pointwise normalize (x / 255) has a
    # Pallas hot path; arbitrary user functionals run whatever callable is
    # passed in (same semantics as the PyTorch module).

    def __init__(self, functional):
        self.functional = functional

    def __call__(self, sample_dict):
        sample_dict["video"] = self.functional(sample_dict["video"])
        return sample_dict


if __name__ == "__main__":
    key = jax.random.PRNGKey(0)
    k1, k2 = jax.random.split(key)

    # Small video clip: T=2 frames, C=4 channels, H=16, W=16 (channels-first), uint8.
    video_u8 = jax.random.randint(k1, (2, 4, 16, 16), 0, 256, dtype=jnp.int32).astype(jnp.uint8)
    sample = {"video": video_u8, "label": jnp.int32(3)}

    # Force the Pallas path even for this tiny demo clip.
    module = FunctionalModule(lambda v: _apply_functional_pallas(v, min_pallas_bytes=0))
    out = module(sample)
    result = jax.block_until_ready(out["video"])

    # Reference check against plain JAX.
    ref = video_u8.astype(jnp.float32) / 255.0
    assert result.shape == video_u8.shape
    assert result.dtype == jnp.float32
    assert jnp.allclose(result, ref, atol=1e-6), "mismatch vs reference"
    # Non-video keys pass through untouched.
    assert out["label"] == 3

    # Exercise the rare pad/slice fallback (numel not a multiple of 128).
    odd_u8 = jax.random.randint(k2, (3, 5, 7, 11), 0, 256, dtype=jnp.int32).astype(jnp.uint8)
    odd_out = jax.block_until_ready(_apply_functional_pallas(odd_u8, min_pallas_bytes=0))
    odd_ref = odd_u8.astype(jnp.float32) / 255.0
    assert odd_out.shape == odd_u8.shape and odd_out.dtype == jnp.float32
    assert jnp.allclose(odd_out, odd_ref, atol=1e-6), "pad-path mismatch vs reference"

    # Small-input fast path (default threshold skips Pallas).
    fast = jax.block_until_ready(_apply_functional_pallas(video_u8))
    assert jnp.allclose(fast, ref, atol=1e-6), "fast-path mismatch vs reference"

    print("KERNEL_OK")
</pallas_src>

<mosaic_0001>
module attributes {stable_mosaic.version = 11 : i64} {
  func.func @_normalize_kernel(%arg0: i32, %arg1: memref<1x2048xi8, #tpu.memory_space<vmem>>, %arg2: memref<1x2048xf32, #tpu.memory_space<vmem>>) attributes {dimension_semantics = [#tpu.dimension_semantics<parallel>], iteration_bounds = array<i64: 1>, scalar_prefetch = 0 : i64, scratch_operands = 0 : i64, tpu.core_type = #tpu.core_type<tc>, window_params = [{transform_indices = @transform_0, window_bounds = array<i64: 1, 2048>}, {transform_indices = @transform_1, window_bounds = array<i64: 1, 2048>}]} {
    %c0 = arith.constant 0 : index
    %c0_0 = arith.constant 0 : index
    %0 = vector.load %arg1[%c0, %c0_0] : memref<1x2048xi8, #tpu.memory_space<vmem>>, vector<1x2048xi8>
    %1 = arith.extui %0 : vector<1x2048xi8> to vector<1x2048xi32>
    %2 = arith.sitofp %1 : vector<1x2048xi32> to vector<1x2048xf32>
    %cst = arith.constant 2.550000e+02 : f32
    %3 = vector.broadcast %cst : f32 to vector<1x2048xf32>
    %4 = arith.divf %2, %3 : vector<1x2048xf32>
    %c0_1 = arith.constant 0 : index
    %c0_2 = arith.constant 0 : index
    %5 = vector.load %arg2[%c0_1, %c0_2] : memref<1x2048xf32, #tpu.memory_space<vmem>>, vector<1x2048xf32>
    tpu.vector_store %arg2[%c0_1, %c0_2], %4 {strides = array<i32>} : memref<1x2048xf32, #tpu.memory_space<vmem>>, vector<1x2048xf32>,
    return
  }
  func.func @transform_0(%arg0: i32) -> (i32, i32) {
    %c0_i32 = arith.constant 0 : i32
    %c0_i32_0 = arith.constant 0 : i32
    return %arg0, %c0_i32 : i32, i32
  }
  func.func @transform_1(%arg0: i32) -> (i32, i32) {
    %c0_i32 = arith.constant 0 : i32
    %c0_i32_0 = arith.constant 0 : i32
    return %arg0, %c0_i32 : i32, i32
  }
}

</mosaic_0001>

<bundles_post_ra>
// kernel: tpu_custom_call.1
= control target key start
LH: loop header
LB: loop body
LE: loop exit
PB: predicated region body
PF: predicated region fallthrough
CT: control target
= control target key end

     0   :  { %6 = vsyncpa [#allocation3], 0  ;;  %s261_s0 = inlined_call_operand.hbm [shape: u8[1,2048], index: 0, kind: input, shape index: {}]   ;;  %s262_s1 = inlined_call_operand.hbm [shape: f32[1,2048], index: 1, kind: output, shape index: {}]  }
   0x1   :  { %7 = vsyncpa [#allocation4], 0  ;;  %s224_s6 = smov [#allocation2]   ;;  %s176_s10 = scalar_lea.hbm %s261_s0, 256 }
   0x2   :  { %s14_s7 = sshll.u32 %s224_s6, 4  ;;  %p177_p0 = scmp.ne.s32.totalorder %s261_s0, %s176_s10  ;;  %s15_s7 = int_to_ptr.vmem [resolvable:$true] %s14_s7 }
   0x3   :  { %p180_p1 = scmp.lt.u32.totalorder %s176_s10, %s261_s0 }
   0x5   :  { %p182_p2 = pnand %p180_p1, %p177_p0 }
   0x7   :  { %185 = shalt.err (!%p182_p2)
}
   0x8   :  { %s186_s15 = scalar_lea.vmem %s15_s7, 256  ;;  %p191_p4 = scmp.lt.s32.totalorder %s15_s7, %s15_s7 }
   0x9   :  { %p187_p3 = scmp.ne.s32.totalorder %s15_s7, %s186_s15  ;;  %p192_p5 = scmp.lt.s32.totalorder %s186_s15, %s186_s15 }
   0xb   :  { %p193_p6 = por %p192_p5, %p191_p4 }
   0xd   :  { %p194_p7 = pnand %p193_p6, %p187_p3 }
   0xf   :  { %197 = shalt.err (!%p194_p7)
}
  0x10   :  { %17 = dma.hbm_to_vmem [thread:$0]  %s261_s0, 256, %s15_s7, [#allocation3]  }
  0x11   :  { %220 = dma.done.wait [#allocation3], 256  }
  0x12   :  { %221 = vsyncadd [#allocation3], 4294967040  ;;  %v67_v0 = vlaneseq  ;;  %v225_v1 = vmov 1966171168   ;;  %v21_v5 = vld [vmem:[#allocation2] sm:$0xff]  ;;  %v22_v7 = vld [vmem:[#allocation2 + $0x8] sm:$0xff] }
  0x13   :  { %v65_v2 = vunpack.c.l.s4 %v225_v1  ;;  %v23_v8 = vunpack.c.0.s8 %v21_v5  ;;  %v24_v9 = vunpack.c.1.s8 %v21_v5  ;;  %v25_v10 = vunpack.c.2.s8 %v21_v5  ;;  %s226_s0 = smov [#allocation5]  }
  0x14   :  { %v68_v4 = vshrl.u32 %v67_v0, 7  ;;  %v26_v11 = vunpack.c.3.s8 %v21_v5  ;;  %v27_v12 = vunpack.c.0.s8 %v22_v7  ;;  %v28_v13 = vunpack.c.1.s8 %v22_v7  ;;  %s164_s18 = sshll.u32 %s226_s0, 4  ;;  %s165_s18 = int_to_ptr.vmem [resolvable:$true] %s164_s18 }
  0x15   :  { %v66_v3 = vunpack.c.0.s8 %v65_v2  ;;  %v29_v14 = vunpack.c.2.s8 %v22_v7  ;;  %v30_v15 = vunpack.c.3.s8 %v22_v7  ;;  %v31_v16 = vand.u32 255, %v23_v8  ;;  %s198_s19 = scalar_lea.vmem %s165_s18, 256  ;;  %p203_p9 = scmp.lt.s32.totalorder %s165_s18, %s165_s18 }
  0x16   :  { %v32_v17 = vand.u32 255, %v24_v9  ;;  %v33_v18 = vand.u32 255, %v25_v10  ;;  %v34_v19 = vand.u32 255, %v26_v11  ;;  %v35_v20 = vand.u32 255, %v27_v12  ;;  %p199_p8 = scmp.ne.s32.totalorder %s165_s18, %s198_s19  ;;  %p204_p10 = scmp.lt.s32.totalorder %s198_s19, %s198_s19 }
  0x17   :  { %v69_v6 = vsub.s32 %v66_v3, %v68_v4  ;;  %v36_v21 = vand.u32 255, %v28_v13  ;;  %v37_v22 = vand.u32 255, %v29_v14  ;;  %v38_v23 = vand.u32 255, %v30_v15 }
  0x18   :  { %v39_v24 = vcvt.s32.f32 %v31_v16  ;;  %v40_v25 = vcvt.s32.f32 %v32_v17  ;;  %v41_v26 = vcvt.s32.f32 %v33_v18  ;;  %v42_v27 = vcvt.s32.f32 %v34_v19  ;;  %p205_p11 = por %p204_p10, %p203_p9 }
  0x19   :  { %v43_v28 = vcvt.s32.f32 %v35_v20  ;;  %v44_v29 = vcvt.s32.f32 %v36_v21  ;;  %v45_v30 = vcvt.s32.f32 %v37_v22  ;;  %v46_v31 = vcvt.s32.f32 %v38_v23 }
  0x1a   :  { %v48_v32 = vmul.f32 0.003921569, %v39_v24  ;;  %v49_v33 = vmul.f32 0.003921569, %v40_v25  ;;  %v50_v34 = vmul.f32 0.003921569, %v41_v26  ;;  %p206_p12 = pnand %p205_p11, %p199_p8 }
  0x1b   :  { %v51_v35 = vmul.f32 0.003921569, %v42_v27  ;;  %v52_v36 = vmul.f32 0.003921569, %v43_v28  ;;  %v53_v37 = vmul.f32 0.003921569, %v44_v29 }
  0x1c   :  { %v70_v38 = vrot.slane %v48_v32, %v69_v6  ;;  %v77_v39 = vrot.slane %v49_v33, %v69_v6  ;;  %v84_v40 = vrot.slane %v50_v34, %v69_v6  ;;  %v54_v41 = vmul.f32 0.003921569, %v45_v30 }
  0x1d   :  { %v91_v42 = vrot.slane %v51_v35, %v69_v6  ;;  %v55_v43 = vmul.f32 0.003921569, %v46_v31  ;;  %v115_v44 = vrot.slane %v52_v36, %v69_v6  ;;  %v122_v45 = vrot.slane %v53_v37, %v69_v6 }
  0x1e   :  { %v92_v46 = vcombine.low %v70_v38, %v77_v39  ;;  %v129_v47 = vrot.slane %v54_v41, %v69_v6 }
  0x1f   :  { %v93_v48 = vcombine.low %v84_v40, %v91_v42  ;;  %v136_v49 = vrot.slane %v55_v43, %v69_v6  ;;  %v137_v50 = vcombine.low %v115_v44, %v122_v45 }
  0x20   :  { %v100_v51 = vrot.slane %v92_v46, %v69_v6 }
  0x21   :  { %v107_v52 = vrot.slane %v93_v48, %v69_v6  ;;  %v138_v53 = vcombine.low %v129_v47, %v136_v49  ;;  %v145_v54 = vrot.slane %v137_v50, %v69_v6 }
  0x23   :  { %v108_v55 = vcombine.low %v100_v51, %v107_v52  ;;  %v152_v56 = vrot.slane %v138_v53, %v69_v6 }
  0x25   :  { %156 = vst [vmem:[#allocation5] sm:$0xff] %v108_v55  ;;  %v153_v57 = vcombine.low %v145_v54, %v152_v56 }
  0x27   :  { %157 = vst [vmem:[#allocation5 + $0x8] sm:$0xff] %v153_v57 }
  0x28   :  { %209 = shalt.err (!%p206_p12)
}
  0x29   :  { %s210_s22 = scalar_lea.hbm %s262_s1, 256 }
  0x2a   :  { %p211_p13 = scmp.ne.s32.totalorder %s262_s1, %s210_s22  ;;  %p214_p0 = scmp.lt.u32.totalorder %s210_s22, %s262_s1 }
  0x2c   :  { %p216_p1 = pnand %p214_p0, %p211_p13 }
  0x2e   :  { %219 = shalt.err (!%p216_p1)
}
  0x2f   :  { %167 = dma.vmem_to_hbm [thread:$0]  %s165_s18, 256, %s262_s1, [#allocation4]  }
  0x30   :  { %222 = dma.done.wait [#allocation4], 256  }
  0x31   :  { %223 = vsyncadd [#allocation4], 4294967040 }
  0x32   :  { %171 = vsyncpa [#allocation3], 1 }
  0x33   :  { %172 = vsyncpa [#allocation4], 1 }

</bundles_post_ra>
